<compile_context>
chip_gen: v5e
topology: v5e:2x2
jax: 0.10.0
libtpu: 0.0.40
codegen_flags: <defaults>
</compile_context>

<pallas_src>
import jax
import jax.numpy as jnp
from jax.experimental import pallas as pl
from jax.experimental.pallas import tpu as pltpu


LANE = 128      # lane width: pad all feature dims to a multiple of this
SUBLANE = 8     # sublane width: pad batch to a multiple of this


def _round_up(v, m):
    return ((v + m - 1) // m) * m


def mlp_kernel(x_ref, w1_ref, b1_ref, w2_ref, b2_ref, o_ref):
    # Layer 1: Linear (bf16 in, f32 MXU accumulate) + bias + ReLU in f32.
    h = jnp.dot(x_ref[...], w1_ref[...], preferred_element_type=jnp.float32)
    h = jnp.maximum(h + b1_ref[...], 0.0)                 # (bm, Hp) f32, VPU
    # Layer 2: Linear (re-cast activations to bf16 for the MXU, f32 acc).
    out = jnp.dot(h.astype(w2_ref.dtype), w2_ref[...],
                  preferred_element_type=jnp.float32)
    o_ref[...] = (out + b2_ref[...]).astype(o_ref.dtype)  # lane-dense store


def init_mlp_params(key, n_inputs, n_action, hidden_dim=32):
    """nn.Linear-style U(-1/sqrt(fan_in), 1/sqrt(fan_in)) init, (in, out) layout."""
    k1, k2, k3, k4 = jax.random.split(key, 4)
    lim1 = 1.0 / jnp.sqrt(jnp.float32(n_inputs))
    lim2 = 1.0 / jnp.sqrt(jnp.float32(hidden_dim))
    w1 = jax.random.uniform(k1, (n_inputs, hidden_dim), jnp.float32, -lim1, lim1)
    b1 = jax.random.uniform(k2, (1, hidden_dim), jnp.float32, -lim1, lim1)
    w2 = jax.random.uniform(k3, (hidden_dim, n_action), jnp.float32, -lim2, lim2)
    b2 = jax.random.uniform(k4, (1, n_action), jnp.float32, -lim2, lim2)
    return w1, b1, w2, b2


def pad_params(w1, b1, w2, b2):
    """Zero-pad feature dims to 128 and cast matmul weights to bf16.

    Padded hidden columns get zero weight + zero bias, ReLU(0)=0, and the
    corresponding padded rows of w2 are zero, so the padded math is exact.
    """
    n_in, hidden = w1.shape
    n_act = w2.shape[1]
    kp, hp, ap = _round_up(n_in, LANE), _round_up(hidden, LANE), _round_up(n_act, LANE)
    w1p = jnp.zeros((kp, hp), jnp.bfloat16).at[:n_in, :hidden].set(w1.astype(jnp.bfloat16))
    b1p = jnp.zeros((1, hp), jnp.float32).at[:, :hidden].set(b1)
    w2p = jnp.zeros((hp, ap), jnp.bfloat16).at[:hidden, :n_act].set(w2.astype(jnp.bfloat16))
    b2p = jnp.zeros((1, ap), jnp.float32).at[:, :n_act].set(b2)
    return w1p, b1p, w2p, b2p


def mlp_forward(x, padded_params, n_action, *, block_rows=256):
    """x: (B, n_inputs) f32; returns (B, n_action) f32."""
    w1p, b1p, w2p, b2p = padded_params
    B, n_in = x.shape
    kp, hp = w1p.shape
    ap = w2p.shape[1]

    # Pad batch to sublane multiple; pad features to the lane-dense width.
    b_pad = _round_up(max(B, SUBLANE), SUBLANE)
    use_grid = b_pad > block_rows
    if use_grid:
        b_pad = _round_up(b_pad, block_rows)
    x_p = jnp.zeros((b_pad, kp), jnp.bfloat16).at[:B, :n_in].set(x.astype(jnp.bfloat16))

    flops = 2 * b_pad * (kp * hp + hp * ap)
    bytes_accessed = (x_p.size * 2 + w1p.size * 2 + w2p.size * 2
                      + b1p.size * 4 + b2p.size * 4 + b_pad * ap * 4)
    ce = pl.CostEstimate(flops=flops, transcendentals=0,
                         bytes_accessed=bytes_accessed)
    out_shape = jax.ShapeDtypeStruct((b_pad, ap), jnp.float32)

    if not use_grid:
        # Tiny problem: gridless call, everything resident in VMEM, no
        # pipeline/grid bookkeeping.
        out = pl.pallas_call(
            mlp_kernel,
            out_shape=out_shape,
            in_specs=[pl.BlockSpec(memory_space=pltpu.MemorySpace.VMEM)] * 5,
            out_specs=pl.BlockSpec(memory_space=pltpu.MemorySpace.VMEM),
            cost_estimate=ce,
        )(x_p, w1p, b1p, w2p, b2p)
    else:
        # Large batch: tile the batch dimension, keep weights/biases
        # VMEM-resident (constant block index), shard across TCs on v7x.
        grid = (b_pad // block_rows,)
        out = pl.pallas_call(
            mlp_kernel,
            out_shape=out_shape,
            grid_spec=pltpu.PrefetchScalarGridSpec(
                num_scalar_prefetch=0,
                grid=grid,
                in_specs=[
                    pl.BlockSpec((block_rows, kp), lambda i: (i, 0)),
                    pl.BlockSpec(w1p.shape, lambda i: (0, 0)),
                    pl.BlockSpec(b1p.shape, lambda i: (0, 0)),
                    pl.BlockSpec(w2p.shape, lambda i: (0, 0)),
                    pl.BlockSpec(b2p.shape, lambda i: (0, 0)),
                ],
                out_specs=pl.BlockSpec((block_rows, ap), lambda i: (i, 0)),
            ),
            compiler_params=pltpu.CompilerParams(
                dimension_semantics=("parallel",)),
            cost_estimate=ce,
        )(x_p, w1p, b1p, w2p, b2p)

    return out[:B, :n_action]


def _reference(x, w1, b1, w2, b2):
    """Same math as the kernel (bf16 MXU inputs, f32 accumulate/elementwise)."""
    h = jnp.dot(x.astype(jnp.bfloat16), w1.astype(jnp.bfloat16),
                preferred_element_type=jnp.float32)
    h = jnp.maximum(h + b1, 0.0)
    out = jnp.dot(h.astype(jnp.bfloat16), w2.astype(jnp.bfloat16),
                  preferred_element_type=jnp.float32)
    return out + b2


if __name__ == "__main__":
    # Shapes implied by the module: MLP(n_inputs=16, n_action=4,
    # n_hidden_layers=1, hidden_dim=[32]).
    key = jax.random.PRNGKey(0)
    kx, kp, kx2 = jax.random.split(key, 3)

    batch, n_inputs, hidden, n_action = 8, 16, 32, 4
    x = jax.random.normal(kx, (batch, n_inputs), jnp.float32)
    w1, b1, w2, b2 = init_mlp_params(kp, n_inputs, n_action, hidden)
    padded = pad_params(w1, b1, w2, b2)

    # Small-batch path (gridless call).
    out = jax.block_until_ready(mlp_forward(x, padded, n_action))
    ref = _reference(x, w1, b1, w2, b2)
    assert out.shape == (batch, n_action)
    assert jnp.allclose(out, ref, atol=1e-2, rtol=1e-2)
    # Sanity vs full-f32 math of the PyTorch module (looser, bf16 inputs).
    ref_f32 = jnp.maximum(x @ w1 + b1, 0.0) @ w2 + b2
    assert jnp.allclose(out, ref_f32, atol=5e-2, rtol=5e-2)

    # Large-batch path (batch grid, weights VMEM-resident, parallel axis).
    big_batch = 1024
    x_big = jax.random.normal(kx2, (big_batch, n_inputs), jnp.float32)
    out_big = jax.block_until_ready(mlp_forward(x_big, padded, n_action))
    ref_big = _reference(x_big, w1, b1, w2, b2)
    assert out_big.shape == (big_batch, n_action)
    assert jnp.allclose(out_big, ref_big, atol=1e-2, rtol=1e-2)

    # TODO(synk): save_weights/load_weights (torch state_dict IO) and the
    # .cuda()/device plumbing have no Pallas equivalent; only forward() is
    # implemented.
    print("KERNEL_OK")
</pallas_src>

<mosaic_0001>
module attributes {stable_mosaic.version = 11 : i64} {
  func.func @mlp_kernel(%arg0: memref<8x128xbf16, #tpu.memory_space<vmem>>, %arg1: memref<128x128xbf16, #tpu.memory_space<vmem>>, %arg2: memref<1x128xf32, #tpu.memory_space<vmem>>, %arg3: memref<128x128xbf16, #tpu.memory_space<vmem>>, %arg4: memref<1x128xf32, #tpu.memory_space<vmem>>, %arg5: memref<8x128xf32, #tpu.memory_space<vmem>>) attributes {dimension_semantics = [], scalar_prefetch = 0 : i64, scratch_operands = 0 : i64, tpu.core_type = #tpu.core_type<tc>} {
    %c0 = arith.constant 0 : index
    %c0_0 = arith.constant 0 : index
    %0 = vector.load %arg0[%c0, %c0_0] : memref<8x128xbf16, #tpu.memory_space<vmem>>, vector<8x128xbf16>
    %c0_1 = arith.constant 0 : index
    %c0_2 = arith.constant 0 : index
    %1 = vector.load %arg1[%c0_1, %c0_2] : memref<128x128xbf16, #tpu.memory_space<vmem>>, vector<128x128xbf16>
    %cst = arith.constant dense<0.000000e+00> : vector<8x128xf32>
    %2 = tpu.matmul %0, %1, %cst {dimension_numbers = #tpu.dot_dimension_numbers<[1], [0], [0], [1], [0, 0, 1, 1], [], []>} : vector<8x128xbf16>, vector<128x128xbf16>, vector<8x128xf32> -> vector<8x128xf32>
    %c0_3 = arith.constant 0 : index
    %c0_4 = arith.constant 0 : index
    %3 = vector.load %arg2[%c0_3, %c0_4] : memref<1x128xf32, #tpu.memory_space<vmem>>, vector<1x128xf32>
    %4 = vector.broadcast %3 : vector<1x128xf32> to vector<8x128xf32>
    %5 = arith.addf %2, %4 : vector<8x128xf32>
    %cst_5 = arith.constant 0.000000e+00 : f32
    %6 = vector.broadcast %cst_5 : f32 to vector<8x128xf32>
    %7 = arith.maximumf %5, %6 : vector<8x128xf32>
    %8 = arith.truncf %7 : vector<8x128xf32> to vector<8x128xbf16>
    %c0_6 = arith.constant 0 : index
    %c0_7 = arith.constant 0 : index
    %9 = vector.load %arg3[%c0_6, %c0_7] : memref<128x128xbf16, #tpu.memory_space<vmem>>, vector<128x128xbf16>
    %cst_8 = arith.constant dense<0.000000e+00> : vector<8x128xf32>
    %10 = tpu.matmul %8, %9, %cst_8 {dimension_numbers = #tpu.dot_dimension_numbers<[1], [0], [0], [1], [0, 0, 1, 1], [], []>} : vector<8x128xbf16>, vector<128x128xbf16>, vector<8x128xf32> -> vector<8x128xf32>
    %c0_9 = arith.constant 0 : index
    %c0_10 = arith.constant 0 : index
    %11 = vector.load %arg4[%c0_9, %c0_10] : memref<1x128xf32, #tpu.memory_space<vmem>>, vector<1x128xf32>
    %12 = vector.broadcast %11 : vector<1x128xf32> to vector<8x128xf32>
    %13 = arith.addf %10, %12 : vector<8x128xf32>
    %c0_11 = arith.constant 0 : index
    %c0_12 = arith.constant 0 : index
    %14 = vector.load %arg5[%c0_11, %c0_12] : memref<8x128xf32, #tpu.memory_space<vmem>>, vector<8x128xf32>
    tpu.vector_store %arg5[%c0_11, %c0_12], %13 {strides = array<i32>} : memref<8x128xf32, #tpu.memory_space<vmem>>, vector<8x128xf32>,
    return
  }
}

</mosaic_0001>

<bundles_post_ra>
// kernel: tpu_custom_call.1
= control target key start
LH: loop header
LB: loop body
LE: loop exit
PB: predicated region body
PF: predicated region fallthrough
CT: control target
= control target key end

     0   :  { %10 = vsyncpa [#allocation3], 0  ;;  %s494_s0 = inlined_call_operand.hbm [shape: bf16[8,128], index: 0, kind: input, shape index: {}]   ;;  %s495_s1 = inlined_call_operand.hbm [shape: bf16[128,128], index: 1, kind: input, shape index: {}]   ;;  %s496_s2 = inlined_call_operand.vmem [shape: f32[1,128], index: 2, kind: input, shape index: {}]   ;;  %s497_s3 = inlined_call_operand.hbm [shape: bf16[128,128], index: 3, kind: input, shape index: {}]   ;;  %s498_s4 = inlined_call_operand.vmem [shape: f32[1,128], index: 4, kind: input, shape index: {}]   ;;  %s499_s5 = inlined_call_operand.hbm [shape: f32[8,128], index: 5, kind: output, shape index: {}]  }
   0x1   :  { %11 = vsyncpa [#allocation6], 0  ;;  %s28_s20 = sshll.u32 %s495_s1, 4  ;;  %s29_s20 = int_to_ptr.hbm [resolvable:$true] %s28_s20 }
   0x2   :  { %12 = vsyncpa [#allocation4], 0  ;;  %s440_s21 = smov [#allocation5]   ;;  %s18_s25 = sshll.u32 %s494_s0, 4  ;;  %s19_s25 = int_to_ptr.hbm [resolvable:$true] %s18_s25 }
   0x3   :  { %s30_s22 = sshll.u32 %s440_s21, 4  ;;  %s441_s26 = smov 64   ;;  %s31_s22 = int_to_ptr.vmem [resolvable:$true] %s30_s22 }
   0x4   :  { %s442_s27 = smov 4   ;;  %s443_s28 = smov [#allocation2]  }
   0x5   :  { %36 = dma.hbm_to_vmem [thread:$0]  %s29_s20, 1024, %s31_s22, [#allocation6], %s441_s26, %s441_s26, %s442_s27  }
   0x6   :  { %s20_s29 = sshll.u32 %s443_s28, 4  ;;  %s43_s7 = sshll.u32 %s497_s3, 4  ;;  %s21_s29 = int_to_ptr.vmem [resolvable:$true] %s20_s29  ;;  %s44_s7 = int_to_ptr.hbm [resolvable:$true] %s43_s7 }
   0x7   :  { %23 = dma.hbm_to_vmem [thread:$0]  %s19_s25, 64, %s21_s29, [#allocation3]  }
   0x8   :  { %s444_s1 = smov [#allocation7]  }
   0x9   :  { %s45_s8 = sshll.u32 %s444_s1, 4  ;;  %s46_s8 = int_to_ptr.vmem [resolvable:$true] %s45_s8 }
   0xa   :  { %51 = dma.hbm_to_vmem [thread:$0]  %s44_s7, 1024, %s46_s8, [#allocation6], %s441_s26, %s441_s26, %s442_s27  }
   0xb   :  { %434 = dma.done.wait [#allocation3], 64  }
   0xc   :  { %435 = vsyncadd [#allocation3], 4294967232 }
   0xd   :  { %436 = dma.done.wait [#allocation6], 2048  }
   0xe   :  { %437 = vsyncadd [#allocation6], 4294965248  ;;  %v321_v0 = vld [vmem:[#allocation5 + $0x38] sm:$0xff]  ;;  %v320_v1 = vld [vmem:[#allocation5 + $0x30] sm:$0xff]  ;;  %s445_s11 = smov [#allocation8]   ;;  %s239_s15 = sshll.u32 %s499_s5, 4  ;;  %s240_s15 = int_to_ptr.hbm [resolvable:$true] %s239_s15 }
   0xf   :  { %135 = vmatpush.bf16.msra.mxu0 %v321_v0  ;;  %v329_v2 = vld [vmem:[#allocation7 + $0x38] sm:$0xff]  ;;  %v328_v3 = vld [vmem:[#allocation7 + $0x30] sm:$0xff]  ;;  %v319_v4 = vld [vmem:[#allocation5 + $0x28] sm:$0xff]  ;;  %s237_s12 = sshll.u32 %s445_s11, 4  ;;  %s238_s12 = int_to_ptr.vmem [resolvable:$true] %s237_s12 }
  0x10   :  { %218 = vmatpush.bf16.msra.mxu1 %v329_v2  ;;  %v327_v5 = vld [vmem:[#allocation7 + $0x28] sm:$0xff]  ;;  %v318_v6 = vld [vmem:[#allocation5 + $0x20] sm:$0xff]  ;;  %v317_v8 = vld [vmem:[#allocation5 + $0x18] sm:$0xff] }
  0x11   :  { %v326_v7 = vld [vmem:[#allocation7 + $0x20] sm:$0xff]  ;;  %v325_v9 = vld [vmem:[#allocation7 + $0x18] sm:$0xff]  ;;  %v316_v10 = vld [vmem:[#allocation5 + $0x10] sm:$0xff] }
  0x12   :  { %v324_v11 = vld [vmem:[#allocation7 + $0x10] sm:$0xff]  ;;  %v315_v12 = vld [vmem:[#allocation5 + $0x8] sm:$0xff]  ;;  %v314_v13 = vld [vmem:[#allocation5] sm:$0xff] }
  0x13   :  { %136 = vmatpush.bf16.msra.mxu0 %v320_v1  ;;  %v66_v14 = vld [vmem:[#allocation2] sm:$0xf]  ;;  %v323_v15 = vld [vmem:[#allocation7 + $0x8] sm:$0xff]  ;;  %v322_v16 = vld [vmem:[#allocation7] sm:$0xff] }
  0x14   :  { %219 = vmatpush.bf16.msra.mxu1 %v328_v3  ;;  %v336_v17 = vld [vmem:[%s496_s2] ss:$0 sm:$0xff] }
  0x15   :  { %v337_v23 = vld [vmem:[%s498_s4] ss:$0 sm:$0xff] }
  0x17   :  { %137 = vmatpush.bf16.msra.mxu0 %v319_v4 }
  0x18   :  { %220 = vmatpush.bf16.msra.mxu1 %v327_v5 }
  0x1b   :  { %138 = vmatpush.bf16.msra.mxu0 %v318_v6 }
  0x1c   :  { %221 = vmatpush.bf16.msra.mxu1 %v326_v7 }
  0x1f   :  { %139 = vmatpush.bf16.msra.mxu0 %v317_v8 }
  0x20   :  { %222 = vmatpush.bf16.msra.mxu1 %v325_v9 }
  0x23   :  { %140 = vmatpush.bf16.msra.mxu0 %v316_v10 }
  0x24   :  { %223 = vmatpush.bf16.msra.mxu1 %v324_v11 }
  0x27   :  { %141 = vmatpush.bf16.msra.mxu0 %v315_v12 }
  0x28   :  { %224 = vmatpush.bf16.msra.mxu1 %v323_v15 }
  0x2b   :  { %142 = vmatpush.bf16.msra.mxu0 %v314_v13 }
  0x2c   :  { %225 = vmatpush.bf16.msra.mxu1 %v322_v16 }
  0x2e   :  { %143 = vmatmul.bf16.vlgmr.msra.gmra.mxu0 %v66_v14 }
  0xab   :  { %v144_v18 = vpop.f32.mrf.mxu0 }
  0xac   :  { %v145_v19 = vadd.f32 %v336_v17, %v144_v18 }
  0xae   :  { %v148_v20 = vmax.f32 %v145_v19, 0.0 }
  0xb0   :  { %v149_v21 = vpack.c.bf16 %v148_v20, %v148_v20 }
  0xb2   :  { %226 = vmatmul.bf16.vlgmr.msra.gmra.mxu1 %v149_v21 }
  0xb3   :  { %v146_v22 = vpop.f32.mrf.mxu0 }
 0x12f   :  { %v227_v24 = vpop.f32.mrf.mxu1 }
 0x130   :  { %v228_v25 = vadd.f32 %v337_v23, %v227_v24 }
 0x132   :  { %231 = vst [vmem:[#allocation8] sm:$0xff] %v228_v25 }
 0x133   :  { %242 = dma.vmem_to_hbm [thread:$0]  %s238_s12, 128, %s240_s15, [#allocation4]  }
 0x137   :  { %v229_v26 = vpop.f32.mrf.mxu1 }
 0x138   :  { %438 = dma.done.wait [#allocation4], 128  }
 0x139   :  { %439 = vsyncadd [#allocation4], 4294967168 }
 0x13a   :  { %247 = vsyncpa [#allocation3], 1 }
 0x13b   :  { %248 = vsyncpa [#allocation6], 1 }
 0x13c   :  { %249 = vsyncpa [#allocation4], 1 }

</bundles_post_ra>
